<compile_context>
chip_gen: v6e
topology: v6e:2x2x1
jax: 0.10.0
libtpu: 0.0.40
codegen_flags: <defaults>
</compile_context>

<pallas_src>
import jax
import jax.numpy as jnp
from jax import lax
from jax.experimental import pallas as pl
from jax.experimental.pallas import tpu as pltpu

BN_EPS = 1e-5
HIDDEN = [448, 320, 192, 128, 128]          # module's hidden widths
HIDDEN_PADDED = [512, 384, 256, 128, 128]   # lane-padded widths used in-kernel
OUT_DIM = 1
TM_MAX = 1024                               # max batch tile (rows per grid step)


def _cdiv(a, b):
    return -(-a // b)


def _round_up(n, m):
    return _cdiv(n, m) * m


def _mlp_kernel(x_ref, *refs):
    """Fused MLP forward over one batch tile.

    refs = [w1, t1, ..., w5, t5, w6_blk, b6, out_ref]
      w       : [in_pad, out_pad]  bf16, bias+BN folded, zero-padded
      t       : [1, out_pad]       f32 folded shift (b*scale + shift), zero-padded
      w6_blk  : [8, 128]           bf16 final weight in row 0, rows 1..7 zero
      b6      : [1, 1]             f32 final bias
      out_ref : [1, 1, TM]         f32 lane-dense sigmoid output
    """
    out_ref = refs[-1]
    params = refs[:-1]

    h = x_ref[...].astype(jnp.bfloat16)

    idx = 0
    for _ in range(len(HIDDEN)):
        w, t = params[idx], params[idx + 1]
        idx += 2
        z = jnp.dot(h, w[...], preferred_element_type=jnp.float32)
        # folded BN + bias, ReLU in f32, keep activation resident in bf16
        h = jnp.maximum(z + t[...], 0.0).astype(jnp.bfloat16)

    w6_blk, b6 = params[idx], params[idx + 1]
    # Final Linear(128, 1), computed transposed so the result is lane-dense:
    # (8,128) x (TM,128)^T -> (8, TM); row 0 holds the real output row.
    z8 = lax.dot_general(w6_blk[...], h, (((1,), (1,)), ((), ())),
                         preferred_element_type=jnp.float32)
    z = z8[0:1, :] + b6[...]                       # (1, TM)
    out_ref[...] = jax.nn.sigmoid(z).reshape(out_ref.shape)


def init_params(key, input_size):
    """Raw params mirroring the PyTorch module's _init_weights (eval mode)."""
    dims = [input_size] + HIDDEN + [OUT_DIM]
    raw = []
    for li in range(len(dims) - 1):
        fan_in, fan_out = dims[li], dims[li + 1]
        key, wkey = jax.random.split(key)
        # kaiming_normal_(mode='fan_out', nonlinearity='relu') -> std = sqrt(2/fan_out)
        std = (2.0 / fan_out) ** 0.5
        w = jax.random.normal(wkey, (fan_in, fan_out), dtype=jnp.float32) * std
        b = jnp.zeros((fan_out,), dtype=jnp.float32)
        layer = {"w": w, "b": b}
        if li < len(HIDDEN):
            layer["gamma"] = jnp.ones((fan_out,), dtype=jnp.float32)
            layer["beta"] = jnp.zeros((fan_out,), dtype=jnp.float32)
            layer["mean"] = jnp.zeros((fan_out,), dtype=jnp.float32)
            layer["var"] = jnp.ones((fan_out,), dtype=jnp.float32)
        raw.append(layer)
    return raw


def fold_and_pad(raw, input_size):
    """Fold bias + BN into weights, zero-pad hidden widths to lane multiples."""
    flat = []
    prev_pad = input_size
    for li in range(len(HIDDEN)):
        layer = raw[li]
        w, b = layer["w"], layer["b"]
        scale = layer["gamma"] / jnp.sqrt(layer["var"] + BN_EPS)
        shift = layer["beta"] - layer["mean"] * scale
        w_f = w * scale[None, :]                      # [in, out]
        t_f = (b * scale + shift)[None, :]            # [1, out]
        in_act, out_act = w_f.shape
        out_pad = HIDDEN_PADDED[li]
        w_p = jnp.zeros((prev_pad, out_pad), jnp.float32).at[:in_act, :out_act].set(w_f)
        t_p = jnp.zeros((1, out_pad), jnp.float32).at[:, :out_act].set(t_f)
        flat.append(w_p.astype(jnp.bfloat16))         # MXU operand in bf16
        flat.append(t_p)                              # shift stays f32 (VPU path)
        prev_pad = out_pad
    # Final Linear(128, 1): weight in sublane row 0 of an [8, 128] bf16 block
    # (sublane-aligned for the transposed dot), plus scalar bias.
    w6, b6 = raw[-1]["w"], raw[-1]["b"]
    w6_blk = jnp.zeros((8, prev_pad), jnp.float32).at[0, :w6.shape[0]].set(w6[:, 0])
    flat.append(w6_blk.astype(jnp.bfloat16))
    flat.append(b6.reshape(1, 1).astype(jnp.float32))
    return tuple(flat)


def _choose_tiling(batch):
    """Adaptive batch tile; even tile count (when >1) for v7x megacore balance."""
    n_tiles = _cdiv(batch, TM_MAX)
    if n_tiles > 1 and n_tiles % 2 == 1:
        n_tiles += 1
    tm = min(TM_MAX, _round_up(_cdiv(batch, n_tiles), 8))
    return n_tiles, tm


@jax.jit
def binary_classifier_forward(x, flat_params):
    batch, in_features = x.shape
    n_tiles, tm = _choose_tiling(batch)
    padded_batch = n_tiles * tm
    if padded_batch != batch:
        x = jnp.pad(x, ((0, padded_batch - batch), (0, 0)))

    weight_specs = [pl.BlockSpec(p.shape, lambda i: (0, 0)) for p in flat_params]

    # Cost estimate (compute-bound fused MLP) for XLA's scheduler.
    macs = in_features * HIDDEN_PADDED[0]
    prev = HIDDEN_PADDED[0]
    for hpad in HIDDEN_PADDED[1:]:
        macs += prev * hpad
        prev = hpad
    macs += prev                                      # final Linear(128, 1)
    param_bytes = sum(int(p.size) * p.dtype.itemsize for p in flat_params)
    cost = pl.CostEstimate(
        flops=int(2 * padded_batch * macs),
        transcendentals=int(padded_batch),
        bytes_accessed=int(padded_batch * in_features * 4
                           + padded_batch * 4 + param_bytes),
    )

    out = pl.pallas_call(
        _mlp_kernel,
        out_shape=jax.ShapeDtypeStruct((n_tiles, 1, tm), jnp.float32),
        grid=(n_tiles,),
        in_specs=[pl.BlockSpec((tm, in_features), lambda i: (i, 0))] + weight_specs,
        out_specs=pl.BlockSpec((1, 1, tm), lambda i: (i, 0, 0)),
        compiler_params=pltpu.CompilerParams(
            dimension_semantics=("parallel",),
            vmem_limit_bytes=48 * 1024 * 1024,        # safe inside v7x's 64 MiB
        ),
        cost_estimate=cost,
    )(x, *flat_params)
    return out.reshape(padded_batch)[:batch].reshape(batch, OUT_DIM)


def reference_forward(x, flat_params):
    """Pure-JAX mirror of the kernel math (bf16 weights & activations, f32 acc)."""
    h = x.astype(jnp.bfloat16)
    for li in range(len(HIDDEN)):
        w, t = flat_params[2 * li], flat_params[2 * li + 1]
        z = jnp.dot(h, w, preferred_element_type=jnp.float32)
        h = jnp.maximum(z + t, 0.0).astype(jnp.bfloat16)
    w6_blk, b6 = flat_params[-2], flat_params[-1]
    z8 = lax.dot_general(w6_blk, h, (((1,), (1,)), ((), ())),
                         preferred_element_type=jnp.float32)
    z = z8[0:1, :] + b6
    return jax.nn.sigmoid(z).T                        # (batch, 1)


def reference_forward_f32(x, raw):
    """Full-f32 reference of the original module (eval mode), no folding/padding."""
    h = x.astype(jnp.float32)
    for layer in raw:
        h = h @ layer["w"] + layer["b"]
        if "gamma" in layer:
            scale = layer["gamma"] / jnp.sqrt(layer["var"] + BN_EPS)
            shift = layer["beta"] - layer["mean"] * scale
            h = jnp.maximum(h * scale + shift, 0.0)
    return jax.nn.sigmoid(h)


if __name__ == "__main__":
    key = jax.random.PRNGKey(0)
    pkey, xkey = jax.random.split(key)

    batch, input_size = 8, 32
    raw = init_params(pkey, input_size)
    flat = fold_and_pad(raw, input_size)

    x = jax.random.normal(xkey, (batch, input_size), dtype=jnp.float32)
    out = jax.block_until_ready(binary_classifier_forward(x, flat))

    ref = reference_forward(x, flat)
    ref_f32 = reference_forward_f32(x, raw)
    assert out.shape == (batch, OUT_DIM), out.shape
    assert jnp.allclose(out, ref, atol=1e-4, rtol=1e-4), (out, ref)
    assert jnp.allclose(out, ref_f32, atol=3e-2), (out, ref_f32)

    # Multi-tile path: exercises batch padding and the even-n_tiles split.
    batch2 = 1100
    x2 = jax.random.normal(jax.random.PRNGKey(1), (batch2, input_size),
                           dtype=jnp.float32)
    out2 = jax.block_until_ready(binary_classifier_forward(x2, flat))
    ref2 = reference_forward(x2, flat)
    assert out2.shape == (batch2, OUT_DIM), out2.shape
    assert jnp.allclose(out2, ref2, atol=1e-4, rtol=1e-4)

    print("KERNEL_OK")
</pallas_src>

<mosaic_0001>
module attributes {stable_mosaic.version = 11 : i64} {
  func.func @_mlp_kernel(%arg0: i32, %arg1: memref<8x32xf32, #tpu.memory_space<vmem>>, %arg2: memref<32x512xbf16, #tpu.memory_space<vmem>>, %arg3: memref<1x512xf32, #tpu.memory_space<vmem>>, %arg4: memref<512x384xbf16, #tpu.memory_space<vmem>>, %arg5: memref<1x384xf32, #tpu.memory_space<vmem>>, %arg6: memref<384x256xbf16, #tpu.memory_space<vmem>>, %arg7: memref<1x256xf32, #tpu.memory_space<vmem>>, %arg8: memref<256x128xbf16, #tpu.memory_space<vmem>>, %arg9: memref<1x128xf32, #tpu.memory_space<vmem>>, %arg10: memref<128x128xbf16, #tpu.memory_space<vmem>>, %arg11: memref<1x128xf32, #tpu.memory_space<vmem>>, %arg12: memref<8x128xbf16, #tpu.memory_space<vmem>>, %arg13: memref<1x1xf32, #tpu.memory_space<vmem>>, %arg14: memref<1x1x8xf32, #tpu.memory_space<vmem>>) attributes {dimension_semantics = [#tpu.dimension_semantics<parallel>], iteration_bounds = array<i64: 1>, scalar_prefetch = 0 : i64, scratch_operands = 0 : i64, tpu.core_type = #tpu.core_type<tc>, window_params = [{transform_indices = @transform_0, window_bounds = array<i64: 8, 32>}, {pipeline_mode = #tpu.pipeline_mode<synchronous>, transform_indices = @transform_1, window_bounds = array<i64: 32, 512>}, {pipeline_mode = #tpu.pipeline_mode<synchronous>, transform_indices = @transform_2, window_bounds = array<i64: 1, 512>}, {pipeline_mode = #tpu.pipeline_mode<synchronous>, transform_indices = @transform_3, window_bounds = array<i64: 512, 384>}, {pipeline_mode = #tpu.pipeline_mode<synchronous>, transform_indices = @transform_4, window_bounds = array<i64: 1, 384>}, {pipeline_mode = #tpu.pipeline_mode<synchronous>, transform_indices = @transform_5, window_bounds = array<i64: 384, 256>}, {pipeline_mode = #tpu.pipeline_mode<synchronous>, transform_indices = @transform_6, window_bounds = array<i64: 1, 256>}, {pipeline_mode = #tpu.pipeline_mode<synchronous>, transform_indices = @transform_7, window_bounds = array<i64: 256, 128>}, {pipeline_mode = #tpu.pipeline_mode<synchronous>, transform_indices = @transform_8, window_bounds = array<i64: 1, 128>}, {pipeline_mode = #tpu.pipeline_mode<synchronous>, transform_indices = @transform_9, window_bounds = array<i64: 128, 128>}, {pipeline_mode = #tpu.pipeline_mode<synchronous>, transform_indices = @transform_10, window_bounds = array<i64: 1, 128>}, {pipeline_mode = #tpu.pipeline_mode<synchronous>, transform_indices = @transform_11, window_bounds = array<i64: 8, 128>}, {pipeline_mode = #tpu.pipeline_mode<synchronous>, transform_indices = @transform_12, window_bounds = array<i64: 1, 1>}, {transform_indices = @transform_13, window_bounds = array<i64: 1, 1, 8>}]} {
    %c0 = arith.constant 0 : index
    %c0_0 = arith.constant 0 : index
    %0 = vector.load %arg1[%c0, %c0_0] : memref<8x32xf32, #tpu.memory_space<vmem>>, vector<8x32xf32>
    %1 = arith.truncf %0 : vector<8x32xf32> to vector<8x32xbf16>
    %c0_1 = arith.constant 0 : index
    %c0_2 = arith.constant 0 : index
    %2 = vector.load %arg2[%c0_1, %c0_2] : memref<32x512xbf16, #tpu.memory_space<vmem>>, vector<32x512xbf16>
    %cst = arith.constant dense<0.000000e+00> : vector<8x512xf32>
    %3 = tpu.matmul %1, %2, %cst {dimension_numbers = #tpu.dot_dimension_numbers<[1], [0], [0], [1], [0, 0, 1, 1], [], []>} : vector<8x32xbf16>, vector<32x512xbf16>, vector<8x512xf32> -> vector<8x512xf32>
    %c0_3 = arith.constant 0 : index
    %c0_4 = arith.constant 0 : index
    %4 = vector.load %arg3[%c0_3, %c0_4] : memref<1x512xf32, #tpu.memory_space<vmem>>, vector<1x512xf32>
    %5 = vector.broadcast %4 : vector<1x512xf32> to vector<8x512xf32>
    %6 = arith.addf %3, %5 : vector<8x512xf32>
    %cst_5 = arith.constant 0.000000e+00 : f32
    %7 = vector.broadcast %cst_5 : f32 to vector<8x512xf32>
    %8 = arith.maximumf %6, %7 : vector<8x512xf32>
    %9 = arith.truncf %8 : vector<8x512xf32> to vector<8x512xbf16>
    %c0_6 = arith.constant 0 : index
    %c0_7 = arith.constant 0 : index
    %10 = vector.load %arg4[%c0_6, %c0_7] : memref<512x384xbf16, #tpu.memory_space<vmem>>, vector<512x384xbf16>
    %cst_8 = arith.constant dense<0.000000e+00> : vector<8x384xf32>
    %11 = tpu.matmul %9, %10, %cst_8 {dimension_numbers = #tpu.dot_dimension_numbers<[1], [0], [0], [1], [0, 0, 1, 1], [], []>} : vector<8x512xbf16>, vector<512x384xbf16>, vector<8x384xf32> -> vector<8x384xf32>
    %c0_9 = arith.constant 0 : index
    %c0_10 = arith.constant 0 : index
    %12 = vector.load %arg5[%c0_9, %c0_10] : memref<1x384xf32, #tpu.memory_space<vmem>>, vector<1x384xf32>
    %13 = vector.broadcast %12 : vector<1x384xf32> to vector<8x384xf32>
    %14 = arith.addf %11, %13 : vector<8x384xf32>
    %cst_11 = arith.constant 0.000000e+00 : f32
    %15 = vector.broadcast %cst_11 : f32 to vector<8x384xf32>
    %16 = arith.maximumf %14, %15 : vector<8x384xf32>
    %17 = arith.truncf %16 : vector<8x384xf32> to vector<8x384xbf16>
    %c0_12 = arith.constant 0 : index
    %c0_13 = arith.constant 0 : index
    %18 = vector.load %arg6[%c0_12, %c0_13] : memref<384x256xbf16, #tpu.memory_space<vmem>>, vector<384x256xbf16>
    %cst_14 = arith.constant dense<0.000000e+00> : vector<8x256xf32>
    %19 = tpu.matmul %17, %18, %cst_14 {dimension_numbers = #tpu.dot_dimension_numbers<[1], [0], [0], [1], [0, 0, 1, 1], [], []>} : vector<8x384xbf16>, vector<384x256xbf16>, vector<8x256xf32> -> vector<8x256xf32>
    %c0_15 = arith.constant 0 : index
    %c0_16 = arith.constant 0 : index
    %20 = vector.load %arg7[%c0_15, %c0_16] : memref<1x256xf32, #tpu.memory_space<vmem>>, vector<1x256xf32>
    %21 = vector.broadcast %20 : vector<1x256xf32> to vector<8x256xf32>
    %22 = arith.addf %19, %21 : vector<8x256xf32>
    %cst_17 = arith.constant 0.000000e+00 : f32
    %23 = vector.broadcast %cst_17 : f32 to vector<8x256xf32>
    %24 = arith.maximumf %22, %23 : vector<8x256xf32>
    %25 = arith.truncf %24 : vector<8x256xf32> to vector<8x256xbf16>
    %c0_18 = arith.constant 0 : index
    %c0_19 = arith.constant 0 : index
    %26 = vector.load %arg8[%c0_18, %c0_19] : memref<256x128xbf16, #tpu.memory_space<vmem>>, vector<256x128xbf16>
    %cst_20 = arith.constant dense<0.000000e+00> : vector<8x128xf32>
    %27 = tpu.matmul %25, %26, %cst_20 {dimension_numbers = #tpu.dot_dimension_numbers<[1], [0], [0], [1], [0, 0, 1, 1], [], []>} : vector<8x256xbf16>, vector<256x128xbf16>, vector<8x128xf32> -> vector<8x128xf32>
    %c0_21 = arith.constant 0 : index
    %c0_22 = arith.constant 0 : index
    %28 = vector.load %arg9[%c0_21, %c0_22] : memref<1x128xf32, #tpu.memory_space<vmem>>, vector<1x128xf32>
    %29 = vector.broadcast %28 : vector<1x128xf32> to vector<8x128xf32>
    %30 = arith.addf %27, %29 : vector<8x128xf32>
    %cst_23 = arith.constant 0.000000e+00 : f32
    %31 = vector.broadcast %cst_23 : f32 to vector<8x128xf32>
    %32 = arith.maximumf %30, %31 : vector<8x128xf32>
    %33 = arith.truncf %32 : vector<8x128xf32> to vector<8x128xbf16>
    %c0_24 = arith.constant 0 : index
    %c0_25 = arith.constant 0 : index
    %34 = vector.load %arg10[%c0_24, %c0_25] : memref<128x128xbf16, #tpu.memory_space<vmem>>, vector<128x128xbf16>
    %cst_26 = arith.constant dense<0.000000e+00> : vector<8x128xf32>
    %35 = tpu.matmul %33, %34, %cst_26 {dimension_numbers = #tpu.dot_dimension_numbers<[1], [0], [0], [1], [0, 0, 1, 1], [], []>} : vector<8x128xbf16>, vector<128x128xbf16>, vector<8x128xf32> -> vector<8x128xf32>
    %c0_27 = arith.constant 0 : index
    %c0_28 = arith.constant 0 : index
    %36 = vector.load %arg11[%c0_27, %c0_28] : memref<1x128xf32, #tpu.memory_space<vmem>>, vector<1x128xf32>
    %37 = vector.broadcast %36 : vector<1x128xf32> to vector<8x128xf32>
    %38 = arith.addf %35, %37 : vector<8x128xf32>
    %cst_29 = arith.constant 0.000000e+00 : f32
    %39 = vector.broadcast %cst_29 : f32 to vector<8x128xf32>
    %40 = arith.maximumf %38, %39 : vector<8x128xf32>
    %41 = arith.truncf %40 : vector<8x128xf32> to vector<8x128xbf16>
    %c0_30 = arith.constant 0 : index
    %c0_31 = arith.constant 0 : index
    %42 = vector.load %arg12[%c0_30, %c0_31] : memref<8x128xbf16, #tpu.memory_space<vmem>>, vector<8x128xbf16>
    %cst_32 = arith.constant dense<0.000000e+00> : vector<8x8xf32>
    %43 = tpu.matmul %42, %41, %cst_32 {dimension_numbers = #tpu.dot_dimension_numbers<[1], [1], [0], [0], [0, 0, 1, 0], [], []>} : vector<8x128xbf16>, vector<8x128xbf16>, vector<8x8xf32> -> vector<8x8xf32>
    %44 = vector.extract_strided_slice %43 {offsets = [0, 0], sizes = [1, 8], strides = [1, 1]} : vector<8x8xf32> to vector<1x8xf32>
    %c0_33 = arith.constant 0 : index
    %c0_34 = arith.constant 0 : index
    %45 = vector.load %arg13[%c0_33, %c0_34] : memref<1x1xf32, #tpu.memory_space<vmem>>, vector<1x1xf32>
    %46 = vector.broadcast %45 : vector<1x1xf32> to vector<1x8xf32>
    %47 = arith.addf %44, %46 : vector<1x8xf32>
    %48 = arith.negf %47 : vector<1x8xf32>
    %49 = math.exp %48 : vector<1x8xf32>
    %cst_35 = arith.constant 1.000000e+00 : f32
    %50 = vector.broadcast %cst_35 : f32 to vector<1x8xf32>
    %51 = arith.addf %50, %49 : vector<1x8xf32>
    %52 = arith.divf %50, %51 : vector<1x8xf32>
    %53 = vector.shape_cast %52 : vector<1x8xf32> to vector<1x1x8xf32>
    %c0_36 = arith.constant 0 : index
    %c0_37 = arith.constant 0 : index
    %c0_38 = arith.constant 0 : index
    %54 = vector.load %arg14[%c0_36, %c0_37, %c0_38] : memref<1x1x8xf32, #tpu.memory_space<vmem>>, vector<1x1x8xf32>
    tpu.vector_store %arg14[%c0_36, %c0_37, %c0_38], %53 {strides = array<i32>} : memref<1x1x8xf32, #tpu.memory_space<vmem>>, vector<1x1x8xf32>,
    return
  }
  func.func @transform_0(%arg0: i32) -> (i32, i32) {
    %c0_i32 = arith.constant 0 : i32
    %c0_i32_0 = arith.constant 0 : i32
    return %arg0, %c0_i32 : i32, i32
  }
  func.func @transform_1(%arg0: i32) -> (i32, i32) {
    %c0_i32 = arith.constant 0 : i32
    %c0_i32_0 = arith.constant 0 : i32
    %c0_i32_1 = arith.constant 0 : i32
    return %c0_i32, %c0_i32_0 : i32, i32
  }
  func.func @transform_2(%arg0: i32) -> (i32, i32) {
    %c0_i32 = arith.constant 0 : i32
    %c0_i32_0 = arith.constant 0 : i32
    %c0_i32_1 = arith.constant 0 : i32
    return %c0_i32, %c0_i32_0 : i32, i32
  }
  func.func @transform_3(%arg0: i32) -> (i32, i32) {
    %c0_i32 = arith.constant 0 : i32
    %c0_i32_0 = arith.constant 0 : i32
    %c0_i32_1 = arith.constant 0 : i32
    return %c0_i32, %c0_i32_0 : i32, i32
  }
  func.func @transform_4(%arg0: i32) -> (i32, i32) {
    %c0_i32 = arith.constant 0 : i32
    %c0_i32_0 = arith.constant 0 : i32
    %c0_i32_1 = arith.constant 0 : i32
    return %c0_i32, %c0_i32_0 : i32, i32
  }
  func.func @transform_5(%arg0: i32) -> (i32, i32) {
    %c0_i32 = arith.constant 0 : i32
    %c0_i32_0 = arith.constant 0 : i32
    %c0_i32_1 = arith.constant 0 : i32
    return %c0_i32, %c0_i32_0 : i32, i32
  }
  func.func @transform_6(%arg0: i32) -> (i32, i32) {
    %c0_i32 = arith.constant 0 : i32
    %c0_i32_0 = arith.constant 0 : i32
    %c0_i32_1 = arith.constant 0 : i32
    return %c0_i32, %c0_i32_0 : i32, i32
  }
  func.func @transform_7(%arg0: i32) -> (i32, i32) {
    %c0_i32 = arith.constant 0 : i32
    %c0_i32_0 = arith.constant 0 : i32
    %c0_i32_1 = arith.constant 0 : i32
    return %c0_i32, %c0_i32_0 : i32, i32
  }
  func.func @transform_8(%arg0: i32) -> (i32, i32) {
    %c0_i32 = arith.constant 0 : i32
    %c0_i32_0 = arith.constant 0 : i32
    %c0_i32_1 = arith.constant 0 : i32
    return %c0_i32, %c0_i32_0 : i32, i32
  }
  func.func @transform_9(%arg0: i32) -> (i32, i32) {
    %c0_i32 = arith.constant 0 : i32
    %c0_i32_0 = arith.constant 0 : i32
    %c0_i32_1 = arith.constant 0 : i32
    return %c0_i32, %c0_i32_0 : i32, i32
  }
  func.func @transform_10(%arg0: i32) -> (i32, i32) {
    %c0_i32 = arith.constant 0 : i32
    %c0_i32_0 = arith.constant 0 : i32
    %c0_i32_1 = arith.constant 0 : i32
    return %c0_i32, %c0_i32_0 : i32, i32
  }
  func.func @transform_11(%arg0: i32) -> (i32, i32) {
    %c0_i32 = arith.constant 0 : i32
    %c0_i32_0 = arith.constant 0 : i32
    %c0_i32_1 = arith.constant 0 : i32
    return %c0_i32, %c0_i32_0 : i32, i32
  }
  func.func @transform_12(%arg0: i32) -> (i32, i32) {
    %c0_i32 = arith.constant 0 : i32
    %c0_i32_0 = arith.constant 0 : i32
    %c0_i32_1 = arith.constant 0 : i32
    return %c0_i32, %c0_i32_0 : i32, i32
  }
  func.func @transform_13(%arg0: i32) -> (i32, i32, i32) {
    %c0_i32 = arith.constant 0 : i32
    %c0_i32_0 = arith.constant 0 : i32
    %c0_i32_1 = arith.constant 0 : i32
    return %arg0, %c0_i32, %c0_i32_0 : i32, i32, i32
  }
}

</mosaic_0001>

<bundles_post_ra>
// kernel: binary_classifier_forward.1
= control target key start
LH: loop header
LB: loop body
LE: loop exit
PB: predicated region body
PF: predicated region fallthrough
CT: control target
= control target key end

     0   :  { %s2770_s0 = inlined_call_operand.hbm [shape: f32[8,32], index: 0, kind: input, shape index: {}]   ;;  %s2771_s1 = inlined_call_operand.hbm [shape: bf16[32,512], index: 1, kind: input, shape index: {}]   ;;  %s2772_s2 = inlined_call_operand.vmem [shape: f32[1,512], index: 2, kind: input, shape index: {}]   ;;  %s2773_s3 = inlined_call_operand.hbm [shape: bf16[512,384], index: 3, kind: input, shape index: {}]   ;;  %s2774_s4 = inlined_call_operand.hbm [shape: f32[1,384], index: 4, kind: input, shape index: {}]   ;;  %s2775_s5 = inlined_call_operand.hbm [shape: bf16[384,256], index: 5, kind: input, shape index: {}]   ;;  %s2776_s6 = inlined_call_operand.vmem [shape: f32[1,256], index: 6, kind: input, shape index: {}]   ;;  %s2777_s7 = inlined_call_operand.hbm [shape: bf16[256,128], index: 7, kind: input, shape index: {}]   ;;  %s2778_s8 = inlined_call_operand.vmem [shape: f32[1,128], index: 8, kind: input, shape index: {}]   ;;  %s2779_s9 = inlined_call_operand.hbm [shape: bf16[128,128], index: 9, kind: input, shape index: {}]   ;;  %s2780_s10 = inlined_call_operand.vmem [shape: f32[1,128], index: 10, kind: input, shape index: {}]   ;;  %s2781_s11 = inlined_call_operand.vmem [shape: bf16[8,128], index: 11, kind: input, shape index: {}]   ;;  %s2782_s12 = inlined_call_operand.<no memory space> [shape: f32[1,1], index: 12, kind: input, shape index: {}]   ;;  %s2783_s13 = inlined_call_operand.hbm [shape: f32[1,1,8], index: 13, kind: output, shape index: {}]  }
   0x1   :  { %v18_v0 = vstv %s2782_s12 }
   0x2   :  { %19 = vst [vmem:[#allocation2] sm:$0x1] %v18_v0 }
   0x3   :  { %20 = vsyncpa [#allocation4], 0 }
   0x4   :  { %21 = vsyncpa [#allocation7], 0 }
   0x5   :  { %22 = vsyncpa [#allocation10], 0 }
   0x6   :  { %23 = vsyncpa [#allocation13], 0 }
   0x7   :  { %24 = vsyncpa [#allocation5], 0  ;;  %s2598_s27 = smov [#allocation6]  }
   0x8   :  { %s40_s28 = sshll.u32 %s2598_s27, 4  ;;  %s41_s28 = int_to_ptr.vmem [resolvable:$true] %s40_s28 }
   0x9   :  { %s2436_s29 = scalar_lea.vmem %s41_s28, 1024  ;;  %p2441_p1 = scmp.lt.s32.totalorder %s41_s28, %s41_s28 }
   0xa   :  { %p2437_p0 = scmp.ne.s32.totalorder %s41_s28, %s2436_s29  ;;  %p2442_p2 = scmp.lt.s32.totalorder %s2436_s29, %s2436_s29 }
   0xc   :  { %p2443_p3 = por %p2442_p2, %p2441_p1 }
   0xe   :  { %p2444_p4 = pnand %p2443_p3, %p2437_p0 }
  0x10   :  { %2447 = shalt.err (!%p2444_p4)
}
  0x11   :  { %s2599_s30 = smov 256   ;;  %s2600_s14 = smov 16  }
  0x12   :  { %46 = dma.hbm_to_vmem [thread:$0]  %s2771_s1, 1024, %s41_s28, [#allocation7], %s2599_s30, %s2599_s30, %s2600_s14  }
  0x13   :  { %s2601_s16 = smov [#allocation9]   ;;  %s2602_s18 = smov [#allocation12]  }
  0x14   :  { %s67_s17 = sshll.u32 %s2601_s16, 4  ;;  %s90_s19 = sshll.u32 %s2602_s18, 4  ;;  %s68_s17 = int_to_ptr.vmem [resolvable:$true] %s67_s17  ;;  %s91_s19 = int_to_ptr.vmem [resolvable:$true] %s90_s19 }
  0x15   :  { %s2456_s20 = scalar_lea.vmem %s68_s17, 48  ;;  %s2460_s21 = scalar_lea.vmem %s68_s17, 64 }
  0x16   :  { %p2457_p5 = scmp.ne.s32.totalorder %s68_s17, %s2456_s20  ;;  %p2461_p6 = scmp.lt.s32.totalorder %s68_s17, %s68_s17 }
  0x17   :  { %p2462_p7 = scmp.lt.s32.totalorder %s2460_s21, %s2456_s20 }
  0x19   :  { %p2463_p8 = por %p2462_p7, %p2461_p6 }
  0x1b   :  { %p2464_p9 = pnand %p2463_p8, %p2457_p5 }
  0x1d   :  { %2467 = shalt.err (!%p2464_p9)
}
  0x1e   :  { %70 = dma.hbm_to_vmem [thread:$0]  %s2774_s4, 48, %s68_s17, [#allocation10]  }
  0x1f   :  { %s2476_s24 = scalar_lea.vmem %s91_s19, 2048  ;;  %p2481_p11 = scmp.lt.s32.totalorder %s91_s19, %s91_s19 }
  0x20   :  { %p2477_p10 = scmp.ne.s32.totalorder %s91_s19, %s2476_s24  ;;  %p2482_p12 = scmp.lt.s32.totalorder %s2476_s24, %s2476_s24 }
  0x22   :  { %p2483_p13 = por %p2482_p12, %p2481_p11 }
  0x24   :  { %p2484_p0 = pnand %p2483_p13, %p2477_p10 }
  0x26   :  { %2487 = shalt.err (!%p2484_p0)
}
  0x27   :  { %s2603_s1 = smov 64   ;;  %s2604_s25 = smov 4  }
  0x28   :  { %96 = dma.hbm_to_vmem [thread:$0]  %s2777_s7, 2048, %s91_s19, [#allocation13], %s2603_s1, %s2603_s1, %s2604_s25  }
  0x29   :  { %s2605_s28 = smov [#allocation3]   ;;  %s2606_s4 = smov [#allocation8]  }
  0x2a   :  { %s31_s29 = sshll.u32 %s2605_s28, 4  ;;  %s54_s30 = sshll.u32 %s2606_s4, 4  ;;  %s32_s29 = int_to_ptr.vmem [resolvable:$true] %s31_s29  ;;  %s55_s30 = int_to_ptr.vmem [resolvable:$true] %s54_s30 }
  0x2b   :  { %s2496_s14 = scalar_lea.vmem %s32_s29, 128  ;;  %p2501_p2 = scmp.lt.s32.totalorder %s32_s29, %s32_s29 }
  0x2c   :  { %p2497_p1 = scmp.ne.s32.totalorder %s32_s29, %s2496_s14  ;;  %p2502_p3 = scmp.lt.s32.totalorder %s2496_s14, %s2496_s14 }
  0x2e   :  { %p2503_p4 = por %p2502_p3, %p2501_p2 }
  0x30   :  { %p2504_p5 = pnand %p2503_p4, %p2497_p1 }
  0x32   :  { %2507 = shalt.err (!%p2504_p5)
}
  0x33   :  { %34 = dma.hbm_to_vmem [thread:$0]  %s2770_s0, 128, %s32_s29, [#allocation4]  }
  0x34   :  { %s2516_s16 = scalar_lea.vmem %s55_s30, 12288  ;;  %p2521_p7 = scmp.lt.s32.totalorder %s55_s30, %s55_s30 }
  0x35   :  { %p2517_p6 = scmp.ne.s32.totalorder %s55_s30, %s2516_s16  ;;  %p2522_p8 = scmp.lt.s32.totalorder %s2516_s16, %s2516_s16 }
  0x37   :  { %p2523_p9 = por %p2522_p8, %p2521_p7 }
  0x39   :  { %p2524_p10 = pnand %p2523_p9, %p2517_p6 }
  0x3b   :  { %2527 = shalt.err (!%p2524_p10)
}
  0x3c   :  { %s2607_s7 = smov 192   ;;  %s2608_s17 = smov 12  }
  0x3d   :  { %60 = dma.hbm_to_vmem [thread:$0]  %s2773_s3, 12288, %s55_s30, [#allocation7], %s2607_s7, %s2607_s7, %s2608_s17  }
  0x3e   :  { %s2609_s20 = smov [#allocation11]  }
  0x3f   :  { %s76_s21 = sshll.u32 %s2609_s20, 4  ;;  %s77_s21 = int_to_ptr.vmem [resolvable:$true] %s76_s21 }
  0x40   :  { %s2536_s22 = scalar_lea.vmem %s77_s21, 6144  ;;  %p2541_p12 = scmp.lt.s32.totalorder %s77_s21, %s77_s21 }
  0x41   :  { %p2537_p11 = scmp.ne.s32.totalorder %s77_s21, %s2536_s22  ;;  %p2542_p13 = scmp.lt.s32.totalorder %s2536_s22, %s2536_s22 }
  0x43   :  { %p2543_p0 = por %p2542_p13, %p2541_p12 }
  0x45   :  { %p2544_p1 = pnand %p2543_p0, %p2537_p11 }
  0x47   :  { %2547 = shalt.err (!%p2544_p1)
}
  0x48   :  { %s2610_s0 = smov 128   ;;  %s2611_s23 = smov 8  }
  0x49   :  { %82 = dma.hbm_to_vmem [thread:$0]  %s2775_s5, 6144, %s77_s21, [#allocation10], %s2610_s0, %s2610_s0, %s2611_s23  }
  0x4a   :  { %s2612_s27 = smov [#allocation14]  }
  0x4b   :  { %s104_s28 = sshll.u32 %s2612_s27, 4  ;;  %s105_s28 = int_to_ptr.vmem [resolvable:$true] %s104_s28 }
  0x4c   :  { %s2556_s3 = scalar_lea.vmem %s105_s28, 1024  ;;  %p2561_p3 = scmp.lt.s32.totalorder %s105_s28, %s105_s28 }
  0x4d   :  { %p2557_p2 = scmp.ne.s32.totalorder %s105_s28, %s2556_s3  ;;  %p2562_p4 = scmp.lt.s32.totalorder %s2556_s3, %s2556_s3 }
  0x4f   :  { %p2563_p5 = por %p2562_p4, %p2561_p3 }
  0x51   :  { %p2564_p6 = pnand %p2563_p5, %p2557_p2 }
  0x53   :  { %2567 = shalt.err (!%p2564_p6)
}
  0x54   :  { %110 = dma.hbm_to_vmem [thread:$0]  %s2779_s9, 1024, %s105_s28, [#allocation13], %s2603_s1, %s2603_s1, %s2604_s25  }
  0x55   :  { %2588 = dma.done.wait [#allocation4], 128  }
  0x56   :  { %2589 = vsyncadd [#allocation4], 4294967168 }
  0x57   :  { %2590 = dma.done.wait [#allocation7], 13312  }
  0x58   :  { %2591 = vsyncadd [#allocation7], 4294953984 }
  0x59   :  { %2592 = dma.done.wait [#allocation10], 6192  }
  0x5a   :  { %2593 = vsyncadd [#allocation10], 4294961104 }
  0x5b   :  { %2594 = dma.done.wait [#allocation13], 3072  }
  0x5c   :  { %2595 = vsyncadd [#allocation13], 4294964224  ;;  %v2613_v1 = vmov 0   ;;  %v2188_v2 = vld [vmem:[#allocation6 + $0x24] ss:$16 sps:$4 sm:$0xff]   ;;  %v139_v6 = vld [vmem:[#allocation3] sm:$0xff] }
  0x5d   :  { %247 = vmatprep.mubr.bf16.mxu1 %v2613_v1  ;;  %2187 = vset.pattern.permute.xlu0 %v2613_v1  ;;  %v2190_v3 = vld [vmem:[#allocation6 + $0x20] ss:$16 sps:$4 sm:$0xff]   ;;  %v2191_v4 = vld [vmem:[#allocation6 + $0x4] ss:$16 sps:$4 sm:$0xff]   ;;  %v2196_v7 = vld [vmem:[#allocation6 + $0x2c] ss:$16 sps:$4 sm:$0xff]   ;;  %v140_v9 = vpack.c.bf16 %v139_v6, %v139_v6 }
  0x5e   :  { %227 = vmatprep.subr.bf16.mxu1 %v2188_v2  ;;  %v2193_v5 = vld [vmem:[#allocation6] ss:$16 sps:$4 sm:$0xff]   ;;  %v2194_v8 = vld [vmem:[#allocation6 + $0x28] ss:$16 sps:$4 sm:$0xff]   ;;  %vm211_vm0 = vcmask 261120   ;;  %vm2615_vm1 = vmmov 0  }
  0x5f   :  { %228 = vmatpush1.bf16.msra.mxu1 %v2190_v3  ;;  %v2200_v10 = vld [vmem:[#allocation8 + $0xac] ss:$12 sps:$4 sm:$0xff]   ;;  %v2202_v11 = vld [vmem:[#allocation8 + $0xa8] ss:$12 sps:$4 sm:$0xff]   ;;  %v2205_v14 = vld [vmem:[#allocation8 + $0x90] ss:$12 sps:$4 sm:$0xff]  }
  0x60   :  { %229 = vmatprep.subr.bf16.mxu1 %v2191_v4  ;;  %v2203_v12 = vld [vmem:[#allocation8 + $0x94] ss:$12 sps:$4 sm:$0xff]   ;;  %v2199_v13 = vld [vmem:[#allocation6 + $0xc] ss:$16 sps:$4 sm:$0xff]   ;;  %962 = vmatprep.subr.bf16.mxu0 %v2200_v10  ;;  %v2197_v16 = vld [vmem:[#allocation6 + $0x8] ss:$16 sps:$4 sm:$0xff]  }
  0x61   :  { %963 = vmatpush1.bf16.msra.mxu0 %v2202_v11  ;;  %v2206_v15 = vld [vmem:[#allocation8 + $0x7c] ss:$12 sps:$4 sm:$0xff]   ;;  %v2210_v17 = vld [vmem:[#allocation8 + $0x22c] ss:$12 sps:$4 sm:$0xff]   ;;  %v2212_v19 = vld [vmem:[#allocation8 + $0x64] ss:$12 sps:$4 sm:$0xff]  }
  0x62   :  { %964 = vmatprep.subr.bf16.mxu0 %v2203_v12  ;;  %v2211_v18 = vld [vmem:[#allocation8 + $0x78] ss:$12 sps:$4 sm:$0xff]   ;;  %v2208_v20 = vld [vmem:[#allocation8 + $0x228] ss:$12 sps:$4 sm:$0xff]   ;;  %v2217_v22 = vld [vmem:[#allocation8 + $0x60] ss:$12 sps:$4 sm:$0xff]  }
  0x63   :  { %230 = vmatpush1.bf16.msra.mxu1 %v2193_v5  ;;  %v2216_v21 = vld [vmem:[#allocation8 + $0x214] ss:$12 sps:$4 sm:$0xff]   ;;  %v2218_v23 = vld [vmem:[#allocation8 + $0x4c] ss:$12 sps:$4 sm:$0xff]   ;;  %v2214_v24 = vld [vmem:[#allocation8 + $0x210] ss:$12 sps:$4 sm:$0xff]  }
  0x64   :  { %268 = vmatprep.subr.bf16.mxu1 %v2196_v7  ;;  %v2222_v25 = vld [vmem:[#allocation8 + $0x1fc] ss:$12 sps:$4 sm:$0xff]   ;;  %v2224_v27 = vld [vmem:[#allocation8 + $0x34] ss:$12 sps:$4 sm:$0xff]   ;;  %v2220_v28 = vld [vmem:[#allocation8 + $0x1f8] ss:$12 sps:$4 sm:$0xff]  }
  0x65   :  { %965 = vmatpush1.bf16.msra.mxu0 %v2205_v14  ;;  %v2223_v26 = vld [vmem:[#allocation8 + $0x48] ss:$12 sps:$4 sm:$0xff]   ;;  %v2228_v29 = vld [vmem:[#allocation8 + $0x1e4] ss:$12 sps:$4 sm:$0xff]   ;;  %v2226_v32 = vld [vmem:[#allocation8 + $0x1e0] ss:$12 sps:$4 sm:$0xff]  }
  0x66   :  { %1892 = vmatmul.mubr.msk.bf16.vlgmr.msra.gmra.mxu1 %vm211_vm0, %v140_v9  ;;  %966 = vmatprep.subr.bf16.mxu0 %v2206_v15  ;;  %v2229_v30 = vld [vmem:[#allocation8 + $0x30] ss:$12 sps:$4 sm:$0xff]   ;;  %v2234_v33 = vld [vmem:[#allocation8 + $0x1cc] ss:$12 sps:$4 sm:$0xff]   ;;  %v2232_v36 = vld [vmem:[#allocation8 + $0x1c8] ss:$12 sps:$4 sm:$0xff]   ;;  %v151_v15 = vlaneseq }
  0x67   :  { %269 = vmatpush1.bf16.msra.mxu1 %v2194_v8  ;;  %288 = vmatprep.mubr.bf16.mxu1 %v2613_v1  ;;  %v2230_v31 = vld [vmem:[#allocation8 + $0x1c] ss:$12 sps:$4 sm:$0xff]   ;;  %v2235_v34 = vld [vmem:[#allocation8 + $0x18] ss:$12 sps:$4 sm:$0xff]   ;;  %v2240_v37 = vld [vmem:[#allocation8 + $0x1b4] ss:$12 sps:$4 sm:$0xff]  }
  0x68   :  { %270 = vmatprep.subr.bf16.mxu1 %v2199_v13  ;;  %v2236_v35 = vld [vmem:[#allocation8 + $0x4] ss:$12 sps:$4 sm:$0xff]   ;;  %v2241_v38 = vld [vmem:[#allocation8] ss:$12 sps:$4 sm:$0xff]   ;;  %v2246_v41 = vld [vmem:[#allocation8 + $0x19c] ss:$12 sps:$4 sm:$0xff]  }
  0x69   :  { %967 = vmatpush1.bf16.msra.mxu0 %v2211_v18  ;;  %v2242_v39 = vld [vmem:[#allocation8 + $0x16c] ss:$12 sps:$4 sm:$0xff]   ;;  %v2238_v40 = vld [vmem:[#allocation8 + $0x1b0] ss:$12 sps:$4 sm:$0xff]   ;;  %v2247_v42 = vld [vmem:[#allocation8 + $0x168] ss:$12 sps:$4 sm:$0xff]  }
  0x6a   :  { %968 = vmatprep.subr.bf16.mxu0 %v2212_v19  ;;  %v2248_v43 = vld [vmem:[#allocation8 + $0x154] ss:$12 sps:$4 sm:$0xff]   ;;  %v2244_v44 = vld [vmem:[#allocation8 + $0x198] ss:$12 sps:$4 sm:$0xff]   ;;  %v2253_v46 = vld [vmem:[#allocation8 + $0x150] ss:$12 sps:$4 sm:$0xff]  }
  0x6b   :  { %271 = vmatpush1.bf16.msra.mxu1 %v2197_v16  ;;  %v2252_v45 = vld [vmem:[#allocation8 + $0x184] ss:$12 sps:$4 sm:$0xff]   ;;  %v2254_v47 = vld [vmem:[#allocation8 + $0x13c] ss:$12 sps:$4 sm:$0xff]   ;;  %v2250_v48 = vld [vmem:[#allocation8 + $0x180] ss:$12 sps:$4 sm:$0xff]  }
  0x6c   :  { %1003 = vmatprep.subr.bf16.mxu1 %v2210_v17  ;;  %v2258_v49 = vld [vmem:[#allocation8 + $0x2ec] ss:$12 sps:$4 sm:$0xff]   ;;  %v2260_v51 = vld [vmem:[#allocation8 + $0x124] ss:$12 sps:$4 sm:$0xff]   ;;  %v2256_v52 = vld [vmem:[#allocation8 + $0x2e8] ss:$12 sps:$4 sm:$0xff]  }
  0x6d   :  { %969 = vmatpush1.bf16.msra.mxu0 %v2217_v22  ;;  %v2259_v50 = vld [vmem:[#allocation8 + $0x138] ss:$12 sps:$4 sm:$0xff]   ;;  %v2264_v53 = vld [vmem:[#allocation8 + $0x2d4] ss:$12 sps:$4 sm:$0xff]   ;;  %v2262_v56 = vld [vmem:[#allocation8 + $0x2d0] ss:$12 sps:$4 sm:$0xff]  }
  0x6e   :  { %1893 = vmatmul.mubr.msk.bf16.vlgmr.msra.gmra.mxu1 %vm211_vm0, %v140_v9  ;;  %970 = vmatprep.subr.bf16.mxu0 %v2218_v23  ;;  %v2265_v54 = vld [vmem:[#allocation8 + $0x120] ss:$12 sps:$4 sm:$0xff]   ;;  %v2270_v57 = vld [vmem:[#allocation8 + $0x2bc] ss:$12 sps:$4 sm:$0xff]   ;;  %v2268_v60 = vld [vmem:[#allocation8 + $0x2b8] ss:$12 sps:$4 sm:$0xff]  }
  0x6f   :  { %1004 = vmatpush1.bf16.msra.mxu1 %v2208_v20  ;;  %v2266_v55 = vld [vmem:[#allocation8 + $0x10c] ss:$12 sps:$4 sm:$0xff]   ;;  %v2271_v58 = vld [vmem:[#allocation8 + $0x108] ss:$12 sps:$4 sm:$0xff]   ;;  %v2276_v61 = vld [vmem:[#allocation8 + $0x2a4] ss:$12 sps:$4 sm:$0xff]  }
  0x70   :  { %1005 = vmatprep.subr.bf16.mxu1 %v2216_v21  ;;  %v2272_v59 = vld [vmem:[#allocation8 + $0xf4] ss:$12 sps:$4 sm:$0xff]   ;;  %v2277_v62 = vld [vmem:[#allocation8 + $0xf0] ss:$12 sps:$4 sm:$0xff]   ;;  %v2282_v2 = vld [vmem:[#allocation8 + $0x28c] ss:$12 sps:$4 sm:$0xff]  }
  0x71   :  { %971 = vmatpush1.bf16.msra.mxu0 %v2223_v26  ;;  %v2274_v63 = vld [vmem:[#allocation8 + $0x2a0] ss:$12 sps:$4 sm:$0xff]   ;;  %v2278_v0 = vld [vmem:[#allocation8 + $0xdc] ss:$12 sps:$4 sm:$0xff]   ;;  %v2283_v4 = vld [vmem:[#allocation8 + $0xd8] ss:$12 sps:$4 sm:$0xff]  }
  0x72   :  { %972 = vmatprep.subr.bf16.mxu0 %v2224_v27  ;;  %v2280_v3 = vld [vmem:[#allocation8 + $0x288] ss:$12 sps:$4 sm:$0xff]   ;;  %v2284_v5 = vld [vmem:[#allocation8 + $0xc4] ss:$12 sps:$4 sm:$0xff]   ;;  %v2289_v8 = vld [vmem:[#allocation8 + $0xc0] ss:$12 sps:$4 sm:$0xff]  }
  0x73   :  { %1006 = vmatpush1.bf16.msra.mxu1 %v2214_v24  ;;  %v2288_v6 = vld [vmem:[#allocation8 + $0x274] ss:$12 sps:$4 sm:$0xff]   ;;  %v2286_v7 = vld [vmem:[#allocation8 + $0x270] ss:$12 sps:$4 sm:$0xff]   ;;  %v2290_v11 = vld [vmem:[#allocation8 + $0x258] ss:$12 sps:$4 sm:$0xff]  }
  0x74   :  { %1007 = vmatprep.subr.bf16.mxu1 %v2222_v25  ;;  %v2292_v9 = vld [vmem:[#allocation8 + $0x25c] ss:$12 sps:$4 sm:$0xff]   ;;  %v2297_v12 = vld [vmem:[#allocation8 + $0x244] ss:$12 sps:$4 sm:$0xff]   ;;  %v2295_v13 = vld [vmem:[#allocation8 + $0x240] ss:$12 sps:$4 sm:$0xff]  }
  0x75   :  { %973 = vmatpush1.bf16.msra.mxu0 %v2229_v30  ;;  %v2293_v10 = vld [vmem:[#allocation8 + $0x170] ss:$12 sps:$4 sm:$0xff]   ;;  %v2722_v16 = vshrl.u32 %v151_v15, 7  ;;  %v149_v18 = vld [vmem:[%s2772_s2] sm:$0xf]  ;;  %vm1864_vm2 = vcmask 57344  }
  0x76   :  { %974 = vmatprep.subr.bf16.mxu0 %v2230_v31  ;;  %v2301_v14 = vld [vmem:[#allocation8 + $0x2f0] ss:$12 sps:$4 sm:$0xff]   ;;  %v2327_v15 = vld [vmem:[#allocation8 + $0x188] ss:$12 sps:$4 sm:$0xff]  }
  0x77   :  { %1008 = vmatpush1.bf16.msra.mxu1 %v2220_v28  ;;  %v2725_v17 = vsub.s32 0, %v2722_v16  ;;  %v2731_v19 = vsub.s32 1, %v2722_v16  ;;  %v161_v24 = vsub.s32 2, %v2722_v16  ;;  %v165_v27 = vsub.s32 3, %v2722_v16  ;;  %v2404_v16 = vld [vmem:[#allocation12 + $0x68] sm:$0xff]  }
  0x78   :  { %1009 = vmatprep.subr.bf16.mxu1 %v2228_v29 }
  0x79   :  { %975 = vmatpush1.bf16.msra.mxu0 %v2235_v34  ;;  %v154_v20 = vrot.slane %v149_v18, %v2725_v17  ;;  %v158_v21 = vrot.slane %v149_v18, %v2731_v19  ;;  %v162_v31 = vrot.slane %v149_v18, %v161_v24  ;;  %v166_v34 = vrot.slane %v149_v18, %v165_v27  ;;  %v2331_v18 = vld [vmem:[#allocation11 + $0x60] ss:$8 sps:$4 sm:$0xff]   ;;  %v2345_v27 = vld [vmem:[#allocation11 + $0x24] ss:$8 sps:$4 sm:$0xff]  }
  0x7a   :  { %976 = vmatprep.subr.bf16.mxu0 %v2236_v35  ;;  %v2294_v35 = vld [vmem:[#allocation8 + $0xb0] ss:$12 sps:$4 sm:$0xff]  }
  0x7b   :  { %1010 = vmatpush1.bf16.msra.mxu1 %v2226_v32 }
  0x7c   :  { %1011 = vmatprep.subr.bf16.mxu1 %v2234_v33 }
  0x7d   :  { %977 = vmatpush1.bf16.msra.mxu0 %v2241_v38  ;;  %v2298_v38 = vld [vmem:[#allocation8 + $0x158] ss:$12 sps:$4 sm:$0xff]  }
  0x7e   :  { %978 = vmatprep.subr.bf16.mxu0 %v2242_v39 }
  0x7f   :  { %1012 = vmatpush1.bf16.msra.mxu1 %v2232_v36 }
  0x80   :  { %1013 = vmatprep.subr.bf16.mxu1 %v2240_v37 }
  0x81   :  { %979 = vmatpush2.bf16.msra.mxu0 %v2247_v42  ;;  %v2299_v42 = vld [vmem:[#allocation8 + $0x98] ss:$12 sps:$4 sm:$0xff]  }
  0x82   :  { %980 = vmatprep.subr.bf16.mxu0 %v2248_v43 }
  0x83   :  { %1014 = vmatpush1.bf16.msra.mxu1 %v2238_v40 }
  0x84   :  { %1015 = vmatprep.subr.bf16.mxu1 %v2246_v41 }
  0x85   :  { %981 = vmatpush2.bf16.msra.mxu0 %v2253_v46 }
  0x86   :  { %982 = vmatprep.subr.bf16.mxu0 %v2254_v47 }
  0x87   :  { %1016 = vmatpush1.bf16.msra.mxu1 %v2244_v44 }
  0x88   :  { %1017 = vmatprep.subr.bf16.mxu1 %v2252_v45  ;;  %v2300_v45 = vld [vmem:[#allocation8 + $0x140] ss:$12 sps:$4 sm:$0xff]  }
  0x89   :  { %983 = vmatpush2.bf16.msra.mxu0 %v2259_v50  ;;  %v2303_v50 = vld [vmem:[#allocation8 + $0x230] ss:$12 sps:$4 sm:$0xff]  }
  0x8a   :  { %984 = vmatprep.subr.bf16.mxu0 %v2260_v51 }
  0x8b   :  { %1018 = vmatpush1.bf16.msra.mxu1 %v2250_v48 }
  0x8c   :  { %1019 = vmatprep.subr.bf16.mxu1 %v2258_v49  ;;  %v2302_v49 = vld [vmem:[#allocation8 + $0x80] ss:$12 sps:$4 sm:$0xff]  }
  0x8d   :  { %985 = vmatpush2.bf16.msra.mxu0 %v2265_v54  ;;  %v2306_v54 = vld [vmem:[#allocation8 + $0x68] ss:$12 sps:$4 sm:$0xff]  }
  0x8e   :  { %986 = vmatprep.subr.bf16.mxu0 %v2266_v55  ;;  %v2307_v55 = vld [vmem:[#allocation8 + $0x218] ss:$12 sps:$4 sm:$0xff]  }
  0x8f   :  { %1020 = vmatpush2.bf16.msra.mxu1 %v2256_v52  ;;  %v2304_v52 = vld [vmem:[#allocation8 + $0x128] ss:$12 sps:$4 sm:$0xff]  }
  0x90   :  { %1021 = vmatprep.subr.bf16.mxu1 %v2264_v53  ;;  %v2305_v53 = vld [vmem:[#allocation8 + $0x2d8] ss:$12 sps:$4 sm:$0xff]  }
  0x91   :  { %987 = vmatpush2.bf16.msra.mxu0 %v2271_v58  ;;  %v2310_v58 = vld [vmem:[#allocation8 + $0x50] ss:$12 sps:$4 sm:$0xff]  }
  0x92   :  { %988 = vmatprep.subr.bf16.mxu0 %v2272_v59  ;;  %v2311_v59 = vld [vmem:[#allocation8 + $0x200] ss:$12 sps:$4 sm:$0xff]  }
  0x93   :  { %1022 = vmatpush2.bf16.msra.mxu1 %v2262_v56  ;;  %v2308_v56 = vld [vmem:[#allocation8 + $0x110] ss:$12 sps:$4 sm:$0xff]  }
  0x94   :  { %1023 = vmatprep.subr.bf16.mxu1 %v2270_v57  ;;  %v2309_v57 = vld [vmem:[#allocation8 + $0x2c0] ss:$12 sps:$4 sm:$0xff]  }
  0x95   :  { %989 = vmatpush2.bf16.msra.mxu0 %v2277_v62  ;;  %v2314_v62 = vld [vmem:[#allocation8 + $0x38] ss:$12 sps:$4 sm:$0xff]  }
  0x96   :  { %990 = vmatprep.subr.bf16.mxu0 %v2278_v0  ;;  %v2316_v0 = vld [vmem:[#allocation8 + $0xe0] ss:$12 sps:$4 sm:$0xff]  }
  0x97   :  { %1024 = vmatpush2.bf16.msra.mxu1 %v2268_v60  ;;  %v2312_v60 = vld [vmem:[#allocation8 + $0xf8] ss:$12 sps:$4 sm:$0xff]  }
  0x98   :  { %1025 = vmatprep.subr.bf16.mxu1 %v2276_v61  ;;  %v2313_v61 = vld [vmem:[#allocation8 + $0x2a8] ss:$12 sps:$4 sm:$0xff]  }
  0x99   :  { %991 = vmatpush2.bf16.msra.mxu0 %v2283_v4  ;;  %v2319_v4 = vld [vmem:[#allocation8 + $0x1d0] ss:$12 sps:$4 sm:$0xff]  }
  0x9a   :  { %992 = vmatprep.subr.bf16.mxu0 %v2284_v5  ;;  %v2320_v5 = vld [vmem:[#allocation8 + $0xc8] ss:$12 sps:$4 sm:$0xff]  }
  0x9b   :  { %1026 = vmatpush2.bf16.msra.mxu1 %v2274_v63  ;;  %v2315_v63 = vld [vmem:[#allocation8 + $0x1e8] ss:$12 sps:$4 sm:$0xff]  }
  0x9c   :  { %1027 = vmatprep.subr.bf16.mxu1 %v2282_v2  ;;  %v2317_v2 = vld [vmem:[#allocation8 + $0x290] ss:$12 sps:$4 sm:$0xff]  }
  0x9d   :  { %993 = vmatpush2.bf16.msra.mxu0 %v2289_v8  ;;  %v2323_v8 = vld [vmem:[#allocation8 + $0x1b8] ss:$12 sps:$4 sm:$0xff]  }
  0x9e   :  { %2065 = vmatprep.subr.bf16.mxu0 %v2293_v10  ;;  %v2330_v10 = vld [vmem:[#allocation11 + $0x74] ss:$8 sps:$4 sm:$0xff]  }
  0x9f   :  { %1028 = vmatpush2.bf16.msra.mxu1 %v2280_v3  ;;  %v2318_v3 = vld [vmem:[#allocation8 + $0x20] ss:$12 sps:$4 sm:$0xff]  }
  0xa0   :  { %1029 = vmatprep.subr.bf16.mxu1 %v2288_v6  ;;  %v2321_v6 = vld [vmem:[#allocation8 + $0x278] ss:$12 sps:$4 sm:$0xff]  }
  0xa3   :  { %1030 = vmatpush2.bf16.msra.mxu1 %v2286_v7  ;;  %v2322_v7 = vld [vmem:[#allocation8 + $0x8] ss:$12 sps:$4 sm:$0xff]  }
  0xa4   :  { %1031 = vmatprep.subr.bf16.mxu1 %v2292_v9  ;;  %v2324_v9 = vld [vmem:[#allocation8 + $0x260] ss:$12 sps:$4 sm:$0xff]  }
  0xa7   :  { %1032 = vmatpush2.bf16.msra.mxu1 %v2290_v11  ;;  %v2325_v11 = vld [vmem:[#allocation8 + $0x1a0] ss:$12 sps:$4 sm:$0xff]  }
  0xa8   :  { %1033 = vmatprep.subr.bf16.mxu1 %v2297_v12  ;;  %v2328_v12 = vld [vmem:[#allocation11 + $0x70] ss:$8 sps:$4 sm:$0xff]  }
  0xab   :  { %1034 = vmatpush2.bf16.msra.mxu1 %v2295_v13  ;;  %v2326_v13 = vld [vmem:[#allocation8 + $0x248] ss:$12 sps:$4 sm:$0xff]  }
  0xac   :  { %2087 = vmatprep.subr.bf16.mxu1 %v2301_v14  ;;  %v2333_v14 = vld [vmem:[#allocation11 + $0x64] ss:$8 sps:$4 sm:$0xff]  }
 0x126   :  { %v249_v22 = vpop.f32.mrf.mxu1 }
 0x127   :  { %v250_v23 = vadd.f32 %v249_v22, %v154_v20  ;;  %v2336_v20 = vld [vmem:[#allocation11 + $0x54] ss:$8 sps:$4 sm:$0xff]   ;;  %v2339_v22 = vld [vmem:[#allocation11 + $0x44] ss:$8 sps:$4 sm:$0xff]  }
 0x128   :  { %v251_v25 = vpop.f32.mrf.mxu1 }
 0x129   :  { %v252_v26 = vadd.f32 %v251_v25, %v158_v21  ;;  %v297_v28 = vmax.f32 %v250_v23, 0.0  ;;  %v2334_v21 = vld [vmem:[#allocation11 + $0x50] ss:$8 sps:$4 sm:$0xff]   ;;  %v2337_v23 = vld [vmem:[#allocation11 + $0x40] ss:$8 sps:$4 sm:$0xff]  }
 0x12a   :  { %v253_v29 = vpop.f32.mrf.mxu1  ;;  %v2342_v25 = vld [vmem:[#allocation11 + $0x34] ss:$8 sps:$4 sm:$0xff]  }
 0x12b   :  { %v298_v30 = vmax.f32 %v252_v26, 0.0  ;;  %v2739_v36 = vpack.c.bf16 %v297_v28, %v297_v28  ;;  %v2340_v26 = vld [vmem:[#allocation11 + $0x30] ss:$8 sps:$4 sm:$0xff]   ;;  %v2343_v28 = vld [vmem:[#allocation11 + $0x20] ss:$8 sps:$4 sm:$0xff]  }
 0x12c   :  { %v254_v32 = vpop.f32.mrf.mxu1  ;;  %v2348_v29 = vld [vmem:[#allocation11 + $0x14] ss:$8 sps:$4 sm:$0xff]  }
 0x12d   :  { %v302_v33 = vpack.c.bf16 %v298_v30, %v298_v30  ;;  %v2346_v30 = vld [vmem:[#allocation11 + $0x10] ss:$8 sps:$4 sm:$0xff]   ;;  %v2349_v32 = vld [vmem:[#allocation11] ss:$8 sps:$4 sm:$0xff]  }
 0x12e   :  { %v290_v37 = vpop.f32.mrf.mxu1 }
 0x12f   :  { %v291_v39 = vadd.f32 %v290_v37, %v162_v31  ;;  %994 = vmatprep.mubr.bf16.mxu0 %v302_v33  ;;  %v2351_v31 = vld [vmem:[#allocation11 + $0x4] ss:$8 sps:$4 sm:$0xff]   ;;  %v2358_v37 = vld [vmem:[#allocation11 + $0xd0] ss:$8 sps:$4 sm:$0xff]  }
 0x130   :  { %v292_v40 = vpop.f32.mrf.mxu1  ;;  %995 = vmatmul.mubr.bf16.vlgmr.msra.gmra.mxu0 %v2739_v36 }
 0x131   :  { %v293_v41 = vadd.f32 %v292_v40, %v166_v34  ;;  %2066 = vmatpush3.bf16.msra.mxu0 %v2294_v35  ;;  %1076 = vmatprep.mubr.bf16.mxu0 %v302_v33  ;;  %v299_v43 = vmax.f32 %v291_v39, 0.0  ;;  %v2354_v33 = vld [vmem:[#allocation11 + $0xf4] ss:$8 sps:$4 sm:$0xff]   ;;  %v2357_v34 = vld [vmem:[#allocation11 + $0xe4] ss:$8 sps:$4 sm:$0xff]  }
 0x132   :  { %v294_v44 = vpop.f32.mrf.mxu1  ;;  %2067 = vmatprep.subr.bf16.mxu0 %v2298_v38  ;;  %v2355_v35 = vld [vmem:[#allocation11 + $0xe0] ss:$8 sps:$4 sm:$0xff]   ;;  %v2363_v38 = vld [vmem:[#allocation11 + $0xc4] ss:$8 sps:$4 sm:$0xff]   ;;  %v2366_v40 = vld [vmem:[#allocation11 + $0xb4] ss:$8 sps:$4 sm:$0xff]  }
 0x133   :  { %v300_v46 = vmax.f32 %v293_v41, 0.0  ;;  %v2742_v51 = vpack.c.bf16 %v299_v43, %v299_v43  ;;  %v2361_v39 = vld [vmem:[#allocation11 + $0xc0] ss:$8 sps:$4 sm:$0xff]   ;;  %v2364_v41 = vld [vmem:[#allocation11 + $0xb0] ss:$8 sps:$4 sm:$0xff]  }
 0x134   :  { %v295_v47 = vpop.f32.mrf.mxu1  ;;  %v2367_v43 = vld [vmem:[#allocation11 + $0xa0] ss:$8 sps:$4 sm:$0xff]   ;;  %v2378_v44 = vld [vmem:[#allocation11 + $0x174] ss:$8 sps:$4 sm:$0xff]  }
 0x135   :  { %v304_v48 = vpack.c.bf16 %v300_v46, %v300_v46  ;;  %2068 = vmatpush3.bf16.msra.mxu0 %v2299_v42  ;;  %v2369_v42 = vld [vmem:[#allocation11 + $0xa4] ss:$8 sps:$4 sm:$0xff]   ;;  %v2376_v46 = vld [vmem:[#allocation11 + $0x170] ss:$8 sps:$4 sm:$0xff]  }
 0x136   :  { %2069 = vmatprep.subr.bf16.mxu0 %v2300_v45  ;;  %v2372_v45 = vld [vmem:[#allocation11 + $0x94] ss:$8 sps:$4 sm:$0xff]   ;;  %v2381_v47 = vld [vmem:[#allocation11 + $0x164] ss:$8 sps:$4 sm:$0xff]  }
 0x137   :  { %1035 = vmatprep.mubr.bf16.mxu1 %v304_v48 }
 0x138   :  { %1036 = vmatmul.mubr.bf16.vlgmr.msra.gmra.mxu1 %v2742_v51 }
 0x139   :  { %2070 = vmatpush3.bf16.msra.mxu0 %v2302_v49  ;;  %2088 = vmatpush3.bf16.msra.mxu1 %v2303_v50  ;;  %v2370_v49 = vld [vmem:[#allocation11 + $0x90] ss:$8 sps:$4 sm:$0xff]   ;;  %v2384_v50 = vld [vmem:[#allocation11 + $0x154] ss:$8 sps:$4 sm:$0xff]  }
 0x13a   :  { %1116 = vmatprep.mubr.bf16.mxu1 %v304_v48  ;;  %2071 = vmatprep.subr.bf16.mxu0 %v2304_v52  ;;  %v2379_v48 = vld [vmem:[#allocation11 + $0x160] ss:$8 sps:$4 sm:$0xff]   ;;  %v2382_v52 = vld [vmem:[#allocation11 + $0x150] ss:$8 sps:$4 sm:$0xff]  }
 0x13b   :  { %2089 = vmatprep.subr.bf16.mxu1 %v2305_v53  ;;  %v2373_v53 = vld [vmem:[#allocation11 + $0x80] ss:$8 sps:$4 sm:$0xff]  }
 0x13d   :  { %2072 = vmatpush3.bf16.msra.mxu0 %v2306_v54  ;;  %2090 = vmatpush3.bf16.msra.mxu1 %v2307_v55  ;;  %v2387_v54 = vld [vmem:[#allocation11 + $0x144] ss:$8 sps:$4 sm:$0xff]   ;;  %v2385_v55 = vld [vmem:[#allocation11 + $0x140] ss:$8 sps:$4 sm:$0xff]  }
 0x13e   :  { %2073 = vmatprep.subr.bf16.mxu0 %v2308_v56  ;;  %2091 = vmatprep.subr.bf16.mxu1 %v2309_v57  ;;  %v2390_v56 = vld [vmem:[#allocation11 + $0x134] ss:$8 sps:$4 sm:$0xff]   ;;  %v2388_v57 = vld [vmem:[#allocation11 + $0x130] ss:$8 sps:$4 sm:$0xff]  }
 0x141   :  { %2074 = vmatpush3.bf16.msra.mxu0 %v2310_v58  ;;  %2092 = vmatpush3.bf16.msra.mxu1 %v2311_v59  ;;  %v2393_v58 = vld [vmem:[#allocation11 + $0x124] ss:$8 sps:$4 sm:$0xff]   ;;  %v2391_v59 = vld [vmem:[#allocation11 + $0x120] ss:$8 sps:$4 sm:$0xff]  }
 0x142   :  { %2075 = vmatprep.subr.bf16.mxu0 %v2312_v60  ;;  %2093 = vmatprep.subr.bf16.mxu1 %v2313_v61  ;;  %v2396_v60 = vld [vmem:[#allocation11 + $0x114] ss:$8 sps:$4 sm:$0xff]   ;;  %v2394_v61 = vld [vmem:[#allocation11 + $0x110] ss:$8 sps:$4 sm:$0xff]  }
 0x145   :  { %2076 = vmatpush3.bf16.msra.mxu0 %v2314_v62  ;;  %2094 = vmatpush3.bf16.msra.mxu1 %v2315_v63  ;;  %v2399_v62 = vld [vmem:[#allocation11 + $0x104] ss:$8 sps:$4 sm:$0xff]   ;;  %v2397_v63 = vld [vmem:[#allocation11 + $0x100] ss:$8 sps:$4 sm:$0xff]  }
 0x146   :  { %2077 = vmatprep.subr.bf16.mxu0 %v2316_v0  ;;  %2095 = vmatprep.subr.bf16.mxu1 %v2317_v2  ;;  %v433_v0 = vld [vmem:[#allocation9] sm:$0x7] }
 0x149   :  { %2078 = vmatpush3.bf16.msra.mxu0 %v2318_v3  ;;  %2096 = vmatpush3.bf16.msra.mxu1 %v2319_v4  ;;  %v438_v4 = vrot.slane %v433_v0, %v2725_v17 }
 0x14a   :  { %2079 = vmatprep.subr.bf16.mxu0 %v2320_v5  ;;  %2097 = vmatprep.subr.bf16.mxu1 %v2321_v6  ;;  %v442_v6 = vrot.slane %v433_v0, %v2731_v19 }
 0x14d   :  { %2080 = vmatpush3.bf16.msra.mxu0 %v2322_v7  ;;  %2098 = vmatpush3.bf16.msra.mxu1 %v2323_v8 }
 0x14e   :  { %2099 = vmatprep.subr.bf16.mxu1 %v2324_v9  ;;  %1430 = vmatprep.subr.bf16.mxu0 %v2330_v10 }
 0x150   :  { %1077 = vmatmul.mubr.bf16.vlgmr.msra.gmra.mxu0 %v2739_v36  ;;  %v2360_v36 = vld [vmem:[#allocation11 + $0xd4] ss:$8 sps:$4 sm:$0xff]  }
 0x151   :  { %2100 = vmatpush3.bf16.msra.mxu1 %v2325_v11  ;;  %1431 = vmatpush1.bf16.msra.mxu0 %v2328_v12 }
 0x152   :  { %2101 = vmatprep.subr.bf16.mxu1 %v2326_v13  ;;  %1432 = vmatprep.subr.bf16.mxu0 %v2333_v14 }
 0x155   :  { %2102 = vmatpush3.bf16.msra.mxu1 %v2327_v15  ;;  %1433 = vmatpush1.bf16.msra.mxu0 %v2331_v18 }
 0x156   :  { %1434 = vmatprep.subr.bf16.mxu0 %v2336_v20  ;;  %1471 = vmatprep.subr.bf16.mxu1 %v2378_v44  ;;  %v2408_v44 = vld [vmem:[#allocation12 + $0x58] sm:$0xff]  }
 0x158   :  { %1117 = vmatmul.mubr.bf16.vlgmr.msra.gmra.mxu1 %v2742_v51  ;;  %v2375_v51 = vld [vmem:[#allocation11 + $0x84] ss:$8 sps:$4 sm:$0xff]  }
 0x159   :  { %1435 = vmatpush1.bf16.msra.mxu0 %v2334_v21  ;;  %1503 = vmatprep.mubr.bf16.mxu1 %v2613_v1  ;;  %v2352_v1 = vld [vmem:[#allocation11 + $0xf0] ss:$8 sps:$4 sm:$0xff]  }
 0x15a   :  { %1436 = vmatprep.subr.bf16.mxu0 %v2339_v22  ;;  %1472 = vmatpush1.bf16.msra.mxu1 %v2376_v46  ;;  %v2410_v46 = vld [vmem:[#allocation12 + $0x50] sm:$0xff]  }
 0x15b   :  { %1473 = vmatprep.subr.bf16.mxu1 %v2381_v47  ;;  %v2411_v47 = vld [vmem:[#allocation12 + $0x10] sm:$0xff]  }
 0x15d   :  { %1437 = vmatpush1.bf16.msra.mxu0 %v2337_v23 }
 0x15e   :  { %1438 = vmatprep.subr.bf16.mxu0 %v2342_v25  ;;  %1474 = vmatpush1.bf16.msra.mxu1 %v2379_v48  ;;  %v2412_v48 = vld [vmem:[#allocation12 + $0x48] sm:$0xff]  }
 0x15f   :  { %1475 = vmatprep.subr.bf16.mxu1 %v2384_v50  ;;  %v2414_v50 = vld [vmem:[#allocation12 + $0x40] sm:$0xff]  }
 0x161   :  { %1439 = vmatpush1.bf16.msra.mxu0 %v2340_v26 }
 0x162   :  { %1440 = vmatprep.subr.bf16.mxu0 %v2345_v27  ;;  %1476 = vmatpush1.bf16.msra.mxu1 %v2382_v52  ;;  %v2416_v52 = vld [vmem:[#allocation14 + $0x38] sm:$0xff]  }
 0x163   :  { %1477 = vmatprep.subr.bf16.mxu1 %v2387_v54  ;;  %v2417_v54 = vld [vmem:[#allocation14 + $0x30] sm:$0xff]  }
 0x165   :  { %1441 = vmatpush1.bf16.msra.mxu0 %v2343_v28  ;;  %v446_v28 = vrot.slane %v433_v0, %v161_v24  ;;  %v2405_v24 = vld [vmem:[#allocation12 + $0x28] sm:$0xff]  }
 0x166   :  { %1442 = vmatprep.subr.bf16.mxu0 %v2348_v29  ;;  %1478 = vmatpush1.bf16.msra.mxu1 %v2385_v55  ;;  %v2418_v55 = vld [vmem:[#allocation14 + $0x28] sm:$0xff]  }
 0x167   :  { %1479 = vmatprep.subr.bf16.mxu1 %v2390_v56  ;;  %v2419_v56 = vld [vmem:[#allocation14 + $0x20] sm:$0xff]  }
 0x169   :  { %1443 = vmatpush1.bf16.msra.mxu0 %v2346_v30 }
 0x16a   :  { %1444 = vmatprep.subr.bf16.mxu0 %v2351_v31  ;;  %1480 = vmatpush1.bf16.msra.mxu1 %v2388_v57  ;;  %v2420_v57 = vld [vmem:[#allocation14 + $0x18] sm:$0xff]  }
 0x16b   :  { %1481 = vmatprep.subr.bf16.mxu1 %v2393_v58 }
 0x16d   :  { %1445 = vmatpush1.bf16.msra.mxu0 %v2349_v32 }
 0x16e   :  { %1446 = vmatprep.subr.bf16.mxu0 %v2354_v33  ;;  %1482 = vmatpush1.bf16.msra.mxu1 %v2391_v59 }
 0x16f   :  { %1483 = vmatprep.subr.bf16.mxu1 %v2396_v60 }
 0x171   :  { %1447 = vmatpush2.bf16.msra.mxu0 %v2352_v1 }
 0x172   :  { %1448 = vmatprep.subr.bf16.mxu0 %v2357_v34  ;;  %1484 = vmatpush1.bf16.msra.mxu1 %v2394_v61 }
 0x173   :  { %1485 = vmatprep.subr.bf16.mxu1 %v2399_v62  ;;  %v1178_v62 = vld [vmem:[%s2776_s6] sm:$0x3] }
 0x174   :  { %v1187_v0 = vrot.slane %v1178_v62, %v2731_v19  ;;  %v2423_v19 = vld [vmem:[#allocation14] sm:$0xff]  }
 0x175   :  { %1449 = vmatpush2.bf16.msra.mxu0 %v2355_v35 }
 0x176   :  { %1450 = vmatprep.subr.bf16.mxu0 %v2360_v36  ;;  %1486 = vmatpush1.bf16.msra.mxu1 %v2397_v63  ;;  %v1183_v63 = vrot.slane %v1178_v62, %v2725_v17 }
 0x179   :  { %1451 = vmatpush2.bf16.msra.mxu0 %v2358_v37 }
 0x17a   :  { %1452 = vmatprep.subr.bf16.mxu0 %v2363_v38  ;;  %v2400_v38 = vld [vmem:[#allocation12 + $0x78] sm:$0xff]  }
 0x17b   :  { %2109 = vmatprep.subr.bf16.mxu1 %v2400_v38 }
 0x17d   :  { %1453 = vmatpush2.bf16.msra.mxu0 %v2361_v39  ;;  %v2401_v39 = vld [vmem:[#allocation12 + $0x38] sm:$0xff]  }
 0x17e   :  { %1454 = vmatprep.subr.bf16.mxu0 %v2366_v40  ;;  %v2402_v40 = vld [vmem:[#allocation12 + $0x70] sm:$0xff]  }
 0x181   :  { %1455 = vmatpush2.bf16.msra.mxu0 %v2364_v41  ;;  %v2403_v41 = vld [vmem:[#allocation12 + $0x30] sm:$0xff]  }
 0x182   :  { %1456 = vmatprep.subr.bf16.mxu0 %v2369_v42  ;;  %v2406_v42 = vld [vmem:[#allocation12 + $0x60] sm:$0xff]  }
 0x185   :  { %1457 = vmatpush2.bf16.msra.mxu0 %v2367_v43  ;;  %v2407_v43 = vld [vmem:[#allocation12 + $0x20] sm:$0xff]  }
 0x186   :  { %1458 = vmatprep.subr.bf16.mxu0 %v2372_v45  ;;  %v2409_v45 = vld [vmem:[#allocation12 + $0x18] sm:$0xff]  }
 0x189   :  { %1459 = vmatpush2.bf16.msra.mxu0 %v2370_v49  ;;  %v2413_v49 = vld [vmem:[#allocation12 + $0x8] sm:$0xff]  }
 0x18a   :  { %1460 = vmatprep.subr.bf16.mxu0 %v2375_v51  ;;  %v2415_v51 = vld [vmem:[#allocation12] sm:$0xff]  }
 0x18d   :  { %1461 = vmatpush2.bf16.msra.mxu0 %v2373_v53  ;;  %v2614_v53 = vmov 0.0  }
 0x18e   :  { %2142 = vmatprep.subr.bf16.mxu0 %v2614_v53 }
 0x1f0   :  { %v996_v2 = vpop.f32.mrf.mxu0 }
 0x1f1   :  { %v997_v8 = vadd.f32 %v996_v2, %v438_v4 }
 0x1f2   :  { %v998_v3 = vpop.f32.mrf.mxu0 }
 0x1f3   :  { %v999_v10 = vadd.f32 %v998_v3, %v442_v6 }
 0x1f4   :  { %v1000_v5 = vpop.f32.mrf.mxu0 }
 0x1f6   :  { %v1001_v7 = vpop.f32.mrf.mxu0 }
 0x1f8   :  { %v1037_v9 = vpop.f32.mrf.mxu1 }
 0x1f9   :  { %v1038_v11 = vadd.f32 %v1037_v9, %v997_v8 }
 0x1fa   :  { %v1039_v12 = vpop.f32.mrf.mxu1 }
 0x1fb   :  { %v1040_v13 = vadd.f32 %v1039_v12, %v999_v10  ;;  %v1124_v14 = vmax.f32 %v1038_v11, 0.0 }
 0x1fc   :  { %v1041_v15 = vpop.f32.mrf.mxu1 }
 0x1fd   :  { %v1125_v18 = vmax.f32 %v1040_v13, 0.0  ;;  %v1127_v22 = vpack.c.bf16 %v1124_v14, %v1124_v14  ;;  %v2421_v14 = vld [vmem:[#allocation14 + $0x10] sm:$0xff]   ;;  %v2422_v15 = vld [vmem:[#allocation14 + $0x8] sm:$0xff]  }
 0x1fe   :  { %v1042_v20 = vpop.f32.mrf.mxu1 }
 0x1ff   :  { %v1128_v21 = vpack.c.bf16 %v1125_v18, %v1125_v18  ;;  %v2038_v20 = vld [vmem:[%s2778_s8] ss:$0 sm:$0xff] }
 0x201   :  { %1462 = vmatprep.mubr.bf16.mxu0 %v1128_v21 }
 0x202   :  { %1463 = vmatmul.mubr.bf16.vlgmr.msra.gmra.mxu0 %v1127_v22 }
 0x203   :  { %2143 = vmatpush3.bf16.msra.mxu0 %v2416_v52  ;;  %2158 = vmatprep.mubr.msk.bf16.mxu0 %vm2615_vm1, %v2614_v53 }
 0x204   :  { %2144 = vmatprep.subr.bf16.mxu0 %v2614_v53 }
 0x207   :  { %2145 = vmatpush3.bf16.msra.mxu0 %v2417_v54 }
 0x208   :  { %2146 = vmatprep.subr.bf16.mxu0 %v2614_v53 }
 0x20b   :  { %2147 = vmatpush3.bf16.msra.mxu0 %v2418_v55 }
 0x20c   :  { %2148 = vmatprep.subr.bf16.mxu0 %v2614_v53 }
 0x20f   :  { %2149 = vmatpush3.bf16.msra.mxu0 %v2419_v56 }
 0x210   :  { %v2081_v23 = vpop.f32.mrf.mxu0  ;;  %2150 = vmatprep.subr.bf16.mxu0 %v2614_v53 }
 0x212   :  { %v2082_v25 = vpop.f32.mrf.mxu0 }
 0x213   :  { %v2083_v29 = vadd.f32 %v2082_v25, %v2081_v23  ;;  %2151 = vmatpush3.bf16.msra.mxu0 %v2420_v57 }
 0x214   :  { %v2084_v26 = vpop.f32.mrf.mxu0  ;;  %2152 = vmatprep.subr.bf16.mxu0 %v2614_v53 }
 0x215   :  { %v1079_v32 = vadd.f32 %v2083_v29, %v446_v28  ;;  %v1847_v29 = vld [vmem:[#allocation2] sm:$0x1] }
 0x216   :  { %v2085_v27 = vpop.f32.mrf.mxu0  ;;  %1850 = vperm.xlu0 %2187, %v1847_v29  }
 0x217   :  { %2153 = vmatpush3.bf16.msra.mxu0 %v2421_v14 }
 0x218   :  { %v2103_v30 = vpop.f32.mrf.mxu1  ;;  %2154 = vmatprep.subr.bf16.mxu0 %v2614_v53 }
 0x21a   :  { %v2104_v31 = vpop.f32.mrf.mxu1 }
 0x21b   :  { %v2105_v33 = vadd.f32 %v2104_v31, %v2103_v30  ;;  %2155 = vmatpush3.bf16.msra.mxu0 %v2422_v15  ;;  %v2055_v30 = vld [vmem:[%s2780_s10] ss:$0 sm:$0xff]  ;;  %s2616_s10 = smov [#allocation15]  }
 0x21c   :  { %v2106_v1 = vpop.f32.mrf.mxu1  ;;  %2156 = vmatprep.subr.bf16.mxu0 %v2614_v53  ;;  %s1872_s12 = sshll.u32 %s2616_s10, 4  ;;  %s1873_s12 = int_to_ptr.vmem [resolvable:$true] %s1872_s12 }
 0x21d   :  { %v1119_v34 = vadd.f32 %v2105_v33, %v1079_v32  ;;  %s2572_s16 = scalar_lea.vmem %s1873_s12, 32  ;;  %p2573_p8 = scmp.lt.s32.totalorder %s1873_s12, %s1873_s12 }
 0x21e   :  { %v2107_v35 = vpop.f32.mrf.mxu1 }
 0x21f   :  { %v1126_v36 = vmax.f32 %v1119_v34, 0.0  ;;  %2157 = vmatpush3.bf16.msra.mxu0 %v2423_v19 }
 0x221   :  { %v1129_v37 = vpack.c.bf16 %v1126_v36, %v1126_v36 }
 0x223   :  { %1504 = vmatmul.mubr.bf16.vlgmr.msra.gmra.mxu1 %v1129_v37  ;;  %v1806_v37 = vld [vmem:[%s2781_s11] sm:$0xf]  ;;  %s2568_s11 = scalar_lea.vmem %s1873_s12, 16 }
 0x224   :  { %2110 = vmatpush3.bf16.msra.mxu1 %v2401_v39  ;;  %p2569_p7 = scmp.ne.s32.totalorder %s1873_s12, %s2568_s11  ;;  %p2574_p9 = scmp.lt.s32.totalorder %s2572_s16, %s2568_s11 }
 0x225   :  { %2111 = vmatprep.subr.bf16.mxu1 %v2402_v40 }
 0x226   :  { %p2575_p10 = por %p2574_p9, %p2573_p8 }
 0x228   :  { %2112 = vmatpush3.bf16.msra.mxu1 %v2403_v41  ;;  %p2576_p11 = pnand %p2575_p10, %p2569_p7 }
 0x229   :  { %2113 = vmatprep.subr.bf16.mxu1 %v2404_v16 }
 0x22c   :  { %2114 = vmatpush3.bf16.msra.mxu1 %v2405_v24 }
 0x22d   :  { %2115 = vmatprep.subr.bf16.mxu1 %v2406_v42 }
 0x230   :  { %2116 = vmatpush3.bf16.msra.mxu1 %v2407_v43 }
 0x231   :  { %2117 = vmatprep.subr.bf16.mxu1 %v2408_v44 }
 0x234   :  { %2118 = vmatpush3.bf16.msra.mxu1 %v2409_v45 }
 0x235   :  { %2119 = vmatprep.subr.bf16.mxu1 %v2410_v46 }
 0x238   :  { %2120 = vmatpush3.bf16.msra.mxu1 %v2411_v47 }
 0x239   :  { %2121 = vmatprep.subr.bf16.mxu1 %v2412_v48 }
 0x23c   :  { %2122 = vmatpush3.bf16.msra.mxu1 %v2413_v49 }
 0x23d   :  { %2123 = vmatprep.subr.bf16.mxu1 %v2414_v50 }
 0x240   :  { %2124 = vmatpush3.bf16.msra.mxu1 %v2415_v51 }
 0x241   :  { %2162 = vmatprep.subr.bf16.mxu1 %v2614_v53 }
 0x291   :  { %v1851_v38 = vpop.permute.xlu0 %1850 }
 0x292   :  { %v1856_v39 = vrot.slane %v1851_v38, %v2725_v17 }
 0x2c2   :  { %v1464_v58 = vpop.f32.mrf.mxu0 }
 0x2c3   :  { %v1465_v2 = vadd.f32 %v1464_v58, %v1183_v63 }
 0x2c4   :  { %v1466_v59 = vpop.f32.mrf.mxu0 }
 0x2c5   :  { %v1467_v4 = vadd.f32 %v1466_v59, %v1187_v0 }
 0x2c6   :  { %v1468_v60 = vpop.f32.mrf.mxu0 }
 0x2c8   :  { %v1469_v61 = vpop.f32.mrf.mxu0 }
 0x2e3   :  { %v1505_v3 = vpop.f32.mrf.mxu1 }
 0x2e4   :  { %v1506_v5 = vadd.f32 %v1505_v3, %v1465_v2 }
 0x2e5   :  { %v1507_v6 = vpop.f32.mrf.mxu1 }
 0x2e6   :  { %v1508_v7 = vadd.f32 %v1507_v6, %v1467_v4  ;;  %v1512_v8 = vmax.f32 %v1506_v5, 0.0 }
 0x2e7   :  { %v1509_v9 = vpop.f32.mrf.mxu1 }
 0x2e8   :  { %v1513_v10 = vmax.f32 %v1508_v7, 0.0  ;;  %v1514_v13 = vpack.c.bf16 %v1512_v8, %v1512_v8 }
 0x2e9   :  { %v1510_v11 = vpop.f32.mrf.mxu1 }
 0x2ea   :  { %v1515_v12 = vpack.c.bf16 %v1513_v10, %v1513_v10 }
 0x2ec   :  { %1683 = vmatprep.mubr.bf16.mxu1 %v1515_v12 }
 0x2ed   :  { %1684 = vmatmul.mubr.bf16.vlgmr.msra.gmra.mxu1 %v1514_v13 }
 0x2ee   :  { %2164 = vmatprep.mubr.msk.bf16.mxu1 %vm2615_vm1, %v2614_v53 }
 0x3ad   :  { %v2125_v18 = vpop.f32.mrf.mxu1 }
 0x3af   :  { %v2126_v21 = vpop.f32.mrf.mxu1 }
 0x3b0   :  { %v2127_v22 = vadd.f32 %v2126_v21, %v2125_v18 }
 0x3b1   :  { %v2128_v23 = vpop.f32.mrf.mxu1 }
 0x3b2   :  { %v1686_v25 = vadd.f32 %v2127_v22, %v2038_v20 }
 0x3b3   :  { %v2129_v26 = vpop.f32.mrf.mxu1 }
 0x3b4   :  { %v1691_v27 = vmax.f32 %v1686_v25, 0.0 }
 0x3b6   :  { %v1692_v28 = vpack.c.bf16 %v1691_v27, %v1691_v27 }
 0x3b8   :  { %2159 = vmatmul.mubr.bf16.vlgmr.msra.gmra.mxu0 %v1692_v28 }
 0x478   :  { %v1798_v31 = vpop.f32.mrf.mxu0 }
 0x479   :  { %v1799_v32 = vadd.f32 %v2055_v30, %v1798_v31 }
 0x47a   :  { %v2160_v33 = vpop.f32.mrf.mxu0 }
 0x47b   :  { %v1804_v1 = vmax.f32 %v1799_v32, 0.0 }
 0x47c   :  { %v1801_v34 = vpop.f32.mrf.mxu0 }
 0x47d   :  { %v1805_v35 = vpack.c.bf16 %v1804_v1, %v1804_v1 }
 0x47e   :  { %v2161_v36 = vpop.f32.mrf.mxu0 }
 0x47f   :  { %2163 = vmatpush3.bf16.xpose.msra.mxu1 %v1805_v35 }
 0x486   :  { %2165 = vmatmul.mubr.bf16.vlgmr.msra.gmra.mxu1 %v1806_v37 }
 0x546   :  { %v1841_v40 = vpop.f32.mrf.mxu1 }
 0x547   :  { %v1857_v41 = vadd.f32 %v1856_v39, %v1841_v40 }
 0x548   :  { %v2166_v16 = vpop.f32.mrf.mxu1 }
 0x549   :  { %v2064_v24 = vmul.f32 -1.442695, %v1857_v41 }
 0x54a   :  { %v1844_v42 = vpop.f32.mrf.mxu1 }
 0x54b   :  { %2424 = vpow2.f32 %v2064_v24 }
 0x54c   :  { %v2167_v43 = vpop.f32.mrf.mxu1 }
 0x558   :  { %v2425_v44 = vpop.eup %2424 }
 0x559   :  { %v1861_v45 = vadd.f32 1.0, %v2425_v44 }
 0x55b   :  { %2426 = vrcp.f32 %v1861_v45 }
 0x568   :  { %v2427_v46 = vpop.eup %2426 }
 0x569   :  { %1865 = vst.msk [vmem:[#allocation15] sm:$0x1] %vm1864_vm2, %v2427_v46 }
 0x56a   :  { %2579 = shalt.err (!%p2576_p11)
}
 0x56b   :  { %1875 = dma.vmem_to_hbm [thread:$0]  %s1873_s12, 16, %s2783_s13, [#allocation5]  }
 0x56c   :  { %2596 = dma.done.wait [#allocation5], 16  }
 0x56d   :  { %2597 = vsyncadd [#allocation5], 4294967280 }
 0x56e   :  { %1879 = vsyncpa [#allocation4], 1 }
 0x56f   :  { %1880 = vsyncpa [#allocation7], 1 }
 0x570   :  { %1881 = vsyncpa [#allocation10], 1 }
 0x571   :  { %1882 = vsyncpa [#allocation13], 1 }
 0x572   :  { %1883 = vsyncpa [#allocation5], 1 }

</bundles_post_ra>
